<compile_context>
chip_gen: v5e
topology: v5e:2x2
jax: 0.10.0
libtpu: 0.0.40
codegen_flags: <defaults>
</compile_context>

<pallas_src>
import jax
import jax.numpy as jnp
from jax.experimental import pallas as pl
from jax.experimental.pallas import tpu as pltpu

_LANES = 128
_MAX_ROWS_PER_TILE = 2048   # multiple of 8; ~14 MiB double-buffered f32 footprint
_MIN_SPATIAL_TILES = 2      # keep >=2 grid steps per batch (megacore + pipelining)


def _extract_features_kernel(x_ref, color_ref, bright_ref):
    # x_ref:      (3, tile_rows, 128)  lane-dense RGB slab (batch dim squeezed)
    # color_ref:  (3, tile_rows, 128)
    # bright_ref: (1, tile_rows, 128)
    r = x_ref[0]
    g = x_ref[1]
    b = x_ref[2]
    brightness = jnp.maximum(jnp.maximum(r, g), b)   # per-lane VPU max
    denom = brightness + 1e-7
    # Exact divide: bit-identical to the reference, free under the HBM roofline.
    color_ref[0] = r / denom
    color_ref[1] = g / denom
    color_ref[2] = b / denom
    bright_ref[0] = brightness


def _pick_tile_rows(rows: int, max_rows: int, min_tiles: int) -> int:
    """Balanced spatial tiling: multiple-of-8 rows, >= min_tiles when possible."""
    n_tiles = max(pl.cdiv(rows, max_rows), 1)
    if rows >= 2 * 8:
        n_tiles = max(n_tiles, min_tiles)
    tile = pl.cdiv(rows, n_tiles)
    tile = pl.cdiv(tile, 8) * 8            # sublane (8) constraint
    if tile >= rows:
        tile = rows                        # single full-extent tile (constraint waived)
    return tile


def _rgb_features_4d(x4: jax.Array, B: int, rows: int):
    """x4: (B, C, rows, 128) with C >= 3. Returns ((B,3,rows,128), (B,1,rows,128))."""
    tile_rows = _pick_tile_rows(rows, _MAX_ROWS_PER_TILE, _MIN_SPATIAL_TILES)
    num_tiles = pl.cdiv(rows, tile_rows)
    return pl.pallas_call(
        _extract_features_kernel,
        out_shape=(
            jax.ShapeDtypeStruct((B, 3, rows, _LANES), x4.dtype),
            jax.ShapeDtypeStruct((B, 1, rows, _LANES), x4.dtype),
        ),
        grid=(B, num_tiles),
        in_specs=[
            # Batch squeezed; channel block of size 3 at block index 0 selects
            # RGB, so only those 3 channels are ever DMA'd even when C > 3.
            pl.BlockSpec((None, 3, tile_rows, _LANES), lambda b, s: (b, 0, s, 0)),
        ],
        out_specs=(
            pl.BlockSpec((None, 3, tile_rows, _LANES), lambda b, s: (b, 0, s, 0)),
            pl.BlockSpec((None, 1, tile_rows, _LANES), lambda b, s: (b, 0, s, 0)),
        ),
        compiler_params=pltpu.CompilerParams(
            dimension_semantics=("parallel", "parallel"),
        ),
    )(x4)


def extract_features(x: jax.Array):
    """Matches BaseMultiWeightNeuron.extract_features semantics."""
    if x.ndim != 4:
        # Non-4D path is pure slicing (no arithmetic hot path) -> plain JAX glue.
        mid = x.shape[1] // 2
        return x[:, :mid], x[:, mid:]

    B, C, H, W = x.shape
    assert C >= 3, "need at least 3 channels for the rgb path"
    HW = H * W

    if HW % _LANES == 0:
        # Fast path: free reshape, no channel slice / pad / un-pad HBM passes.
        rows = HW // _LANES
        x4 = x.reshape(B, C, rows, _LANES)
        color4, bright4 = _rgb_features_4d(x4, B, rows)
        return color4.reshape(B, 3, H, W), bright4.reshape(B, 1, H, W)

    # Ragged spatial size: pad the RGB slab up to a multiple of 128 lanes.
    # TODO(synk): handle the ragged lane tail in-kernel (masked stores) to avoid
    # this extra HBM pass; it is uncommon for image inputs.
    rows = pl.cdiv(HW, _LANES)
    rgb = x[:, :3].reshape(B, 3, HW)
    rgb = jnp.pad(rgb, ((0, 0), (0, 0), (0, rows * _LANES - HW)))
    x4 = rgb.reshape(B, 3, rows, _LANES)
    color4, bright4 = _rgb_features_4d(x4, B, rows)
    color = color4.reshape(B, 3, rows * _LANES)[:, :, :HW].reshape(B, 3, H, W)
    brightness = bright4.reshape(B, 1, rows * _LANES)[:, :, :HW].reshape(B, 1, H, W)
    return color, brightness


def extract_features_ref(x: jax.Array):
    """Pure-JAX reference mirroring the PyTorch code exactly."""
    if x.ndim == 4:
        rgb = x[:, :3]
        brightness = jnp.max(rgb, axis=1, keepdims=True)
        color = rgb / (brightness + 1e-7)
        return color, brightness
    mid = x.shape[1] // 2
    return x[:, :mid], x[:, mid:]


def _check(x):
    c, br = extract_features(x)
    c = jax.block_until_ready(c)
    br = jax.block_until_ready(br)
    c_ref, br_ref = extract_features_ref(x)
    assert c.shape == c_ref.shape and br.shape == br_ref.shape
    assert jnp.allclose(c, c_ref, atol=1e-6, rtol=1e-6)
    assert jnp.allclose(br, br_ref, atol=1e-6, rtol=1e-6)


if __name__ == "__main__":
    key = jax.random.PRNGKey(0)

    # 4-D NCHW input (module's image path), HW % 128 == 0 -> zero-copy fast path.
    x = jax.random.uniform(key, (2, 4, 16, 16), dtype=jnp.float32)
    _check(x)

    # C == 3, multiple spatial tiles (rows = 32 -> 2 tiles of 16 rows).
    _check(jax.random.uniform(jax.random.PRNGKey(1), (1, 3, 64, 64), dtype=jnp.float32))

    # rows = 18 with 16-row tiles -> exercises the partial last-tile path.
    _check(jax.random.uniform(jax.random.PRNGKey(2), (1, 4, 24, 96), dtype=jnp.float32))

    # Ragged spatial size (HW % 128 != 0) -> padded fallback path.
    _check(jax.random.uniform(jax.random.PRNGKey(3), (2, 5, 10, 10), dtype=jnp.float32))

    # Non-4D (split) path.
    x2 = jax.random.normal(jax.random.PRNGKey(4), (2, 32), dtype=jnp.float32)
    a, b = extract_features(x2)
    a_ref, b_ref = extract_features_ref(x2)
    assert jnp.array_equal(a, a_ref) and jnp.array_equal(b, b_ref)

    print("KERNEL_OK")
</pallas_src>

<mosaic_0001>
module attributes {stable_mosaic.version = 11 : i64} {
  func.func @_extract_features_kernel(%arg0: i32, %arg1: i32, %arg2: memref<1x3x2x128xf32, #tpu.memory_space<vmem>>, %arg3: memref<1x3x2x128xf32, #tpu.memory_space<vmem>>, %arg4: memref<1x1x2x128xf32, #tpu.memory_space<vmem>>) attributes {dimension_semantics = [#tpu.dimension_semantics<parallel>, #tpu.dimension_semantics<parallel>], iteration_bounds = array<i64: 2, 1>, scalar_prefetch = 0 : i64, scratch_operands = 0 : i64, tpu.core_type = #tpu.core_type<tc>, window_params = [{transform_indices = @transform_0, window_bounds = array<i64: 1, 3, 2, 128>}, {transform_indices = @transform_1, window_bounds = array<i64: 1, 3, 2, 128>}, {transform_indices = @transform_2, window_bounds = array<i64: 1, 1, 2, 128>}]} {
    %c0 = arith.constant 0 : index
    %c0_0 = arith.constant 0 : index
    %c0_1 = arith.constant 0 : index
    %c0_2 = arith.constant 0 : index
    %0 = vector.load %arg2[%c0, %c0_0, %c0_1, %c0_2] : memref<1x3x2x128xf32, #tpu.memory_space<vmem>>, vector<1x1x2x128xf32>
    %1 = vector.shape_cast %0 : vector<1x1x2x128xf32> to vector<2x128xf32>
    %c0_3 = arith.constant 0 : index
    %c1 = arith.constant 1 : index
    %c0_4 = arith.constant 0 : index
    %c0_5 = arith.constant 0 : index
    %2 = vector.load %arg2[%c0_3, %c1, %c0_4, %c0_5] : memref<1x3x2x128xf32, #tpu.memory_space<vmem>>, vector<1x1x2x128xf32>
    %3 = vector.shape_cast %2 : vector<1x1x2x128xf32> to vector<2x128xf32>
    %c0_6 = arith.constant 0 : index
    %c2 = arith.constant 2 : index
    %c0_7 = arith.constant 0 : index
    %c0_8 = arith.constant 0 : index
    %4 = vector.load %arg2[%c0_6, %c2, %c0_7, %c0_8] : memref<1x3x2x128xf32, #tpu.memory_space<vmem>>, vector<1x1x2x128xf32>
    %5 = vector.shape_cast %4 : vector<1x1x2x128xf32> to vector<2x128xf32>
    %6 = arith.maximumf %1, %3 : vector<2x128xf32>
    %7 = arith.maximumf %6, %5 : vector<2x128xf32>
    %cst = arith.constant 1.000000e-07 : f32
    %8 = vector.broadcast %cst : f32 to vector<2x128xf32>
    %9 = arith.addf %7, %8 : vector<2x128xf32>
    %10 = arith.divf %1, %9 : vector<2x128xf32>
    %c0_9 = arith.constant 0 : index
    %c0_10 = arith.constant 0 : index
    %c0_11 = arith.constant 0 : index
    %c0_12 = arith.constant 0 : index
    %11 = vector.load %arg3[%c0_9, %c0_10, %c0_11, %c0_12] : memref<1x3x2x128xf32, #tpu.memory_space<vmem>>, vector<1x1x2x128xf32>
    %12 = vector.shape_cast %11 : vector<1x1x2x128xf32> to vector<2x128xf32>
    %13 = vector.shape_cast %10 : vector<2x128xf32> to vector<1x1x2x128xf32>
    tpu.vector_store %arg3[%c0_9, %c0_10, %c0_11, %c0_12], %13 {strides = array<i32>} : memref<1x3x2x128xf32, #tpu.memory_space<vmem>>, vector<1x1x2x128xf32>,
    %14 = arith.divf %3, %9 : vector<2x128xf32>
    %c0_13 = arith.constant 0 : index
    %c1_14 = arith.constant 1 : index
    %c0_15 = arith.constant 0 : index
    %c0_16 = arith.constant 0 : index
    %15 = vector.load %arg3[%c0_13, %c1_14, %c0_15, %c0_16] : memref<1x3x2x128xf32, #tpu.memory_space<vmem>>, vector<1x1x2x128xf32>
    %16 = vector.shape_cast %15 : vector<1x1x2x128xf32> to vector<2x128xf32>
    %17 = vector.shape_cast %14 : vector<2x128xf32> to vector<1x1x2x128xf32>
    tpu.vector_store %arg3[%c0_13, %c1_14, %c0_15, %c0_16], %17 {strides = array<i32>} : memref<1x3x2x128xf32, #tpu.memory_space<vmem>>, vector<1x1x2x128xf32>,
    %18 = arith.divf %5, %9 : vector<2x128xf32>
    %c0_17 = arith.constant 0 : index
    %c2_18 = arith.constant 2 : index
    %c0_19 = arith.constant 0 : index
    %c0_20 = arith.constant 0 : index
    %19 = vector.load %arg3[%c0_17, %c2_18, %c0_19, %c0_20] : memref<1x3x2x128xf32, #tpu.memory_space<vmem>>, vector<1x1x2x128xf32>
    %20 = vector.shape_cast %19 : vector<1x1x2x128xf32> to vector<2x128xf32>
    %21 = vector.shape_cast %18 : vector<2x128xf32> to vector<1x1x2x128xf32>
    tpu.vector_store %arg3[%c0_17, %c2_18, %c0_19, %c0_20], %21 {strides = array<i32>} : memref<1x3x2x128xf32, #tpu.memory_space<vmem>>, vector<1x1x2x128xf32>,
    %c0_21 = arith.constant 0 : index
    %c0_22 = arith.constant 0 : index
    %c0_23 = arith.constant 0 : index
    %c0_24 = arith.constant 0 : index
    %22 = vector.load %arg4[%c0_21, %c0_22, %c0_23, %c0_24] : memref<1x1x2x128xf32, #tpu.memory_space<vmem>>, vector<1x1x2x128xf32>
    %23 = vector.shape_cast %22 : vector<1x1x2x128xf32> to vector<2x128xf32>
    %24 = vector.shape_cast %7 : vector<2x128xf32> to vector<1x1x2x128xf32>
    tpu.vector_store %arg4[%c0_21, %c0_22, %c0_23, %c0_24], %24 {strides = array<i32>} : memref<1x1x2x128xf32, #tpu.memory_space<vmem>>, vector<1x1x2x128xf32>,
    return
  }
  func.func @transform_0(%arg0: i32, %arg1: i32) -> (i32, i32, i32, i32) {
    %c0_i32 = arith.constant 0 : i32
    %c0_i32_0 = arith.constant 0 : i32
    %c0_i32_1 = arith.constant 0 : i32
    return %arg0, %c0_i32, %arg1, %c0_i32_0 : i32, i32, i32, i32
  }
  func.func @transform_1(%arg0: i32, %arg1: i32) -> (i32, i32, i32, i32) {
    %c0_i32 = arith.constant 0 : i32
    %c0_i32_0 = arith.constant 0 : i32
    %c0_i32_1 = arith.constant 0 : i32
    return %arg0, %c0_i32, %arg1, %c0_i32_0 : i32, i32, i32, i32
  }
  func.func @transform_2(%arg0: i32, %arg1: i32) -> (i32, i32, i32, i32) {
    %c0_i32 = arith.constant 0 : i32
    %c0_i32_0 = arith.constant 0 : i32
    %c0_i32_1 = arith.constant 0 : i32
    return %arg0, %c0_i32, %arg1, %c0_i32_0 : i32, i32, i32, i32
  }
}

</mosaic_0001>

<bundles_post_ra>
// kernel: tpu_custom_call.1
= control target key start
LH: loop header
LB: loop body
LE: loop exit
PB: predicated region body
PF: predicated region fallthrough
CT: control target
= control target key end

     0   :  { %8 = vsyncpa [#allocation3], 0  ;;  %s780_s0 = inlined_call_operand.hbm [shape: f32[2,4,2,128], index: 0, kind: input, shape index: {}]   ;;  %s781_s1 = inlined_call_operand.hbm [shape: f32[2,3,2,128], index: 1, kind: output, shape index: {0}]   ;;  %s782_s2 = inlined_call_operand.hbm [shape: f32[2,1,2,128], index: 2, kind: output, shape index: {1}]  }
   0x1   :  { %10 = vsyncpa [#allocation3 + $0x1], 0 }
   0x2   :  { %11 = vsyncpa [#allocation4], 0 }
   0x3   :  { %13 = vsyncpa [#allocation4 + $0x1], 0 }
   0x4   :  { %14 = vsyncpa [#allocation7], 0 }
   0x5   :  { %16 = vsyncpa [#allocation7 + $0x1], 0  ;;  %s640_s9 = smov 0   ;;  %s642_s10 = smov 0  }
   0x6   :  { %s644_s11 = smov 0   ;;  %s646_s12 = smov 0  }
   0x7   :  { %s648_s13 = smov 0   ;;  %s650_s14 = smov 0  }
   0x8 LB: > { %s381_s15 = sadd.s32 4294967295, %s619_s14   ;;  %s382_s16 = sadd.s32 4294967294, %s619_s14   ;;  %s619_s14 = sphi %s650_s14, %s22_s14   ;;  %s615_s13 = sphi %s648_s13, %s791_s13   ;;  %s611_s12 = sphi %s646_s12, %s790_s12   ;;  %s607_s11 = sphi %s644_s11, %s789_s11   ;;  %s603_s10 = sphi %s642_s10, %s788_s10   ;;  %s599_s9 = sphi %s640_s9, %s787_s9  }
   0x9   : > { %s34_s17 = sadd.s32 1, %s615_s13  ;;  %s43_s18 = sadd.s32 1, %s607_s11 }
   0xa   : > { %p36_p0 = scmp.ge.s32.totalorder %s34_s17, 2  ;;  %p50_p1 = scmp.ne.s32.totalorder %s607_s11, %s603_s10 }
   0xb   : > { %p51_p2 = scmp.eq.s32.totalorder %s619_s14, 0  ;;  %p56_p3 = scmp.ne.s32.totalorder %s603_s10, %s599_s9 }
   0xc   : > { %s793_s17 = smov (%p36_p0, %s34_s17), 0  ;;  %p57_p5 = scmp.eq.s32.totalorder %s381_s15, 0 }
   0xd   : > { %p681_p4 = por %p51_p2, %p50_p1  ;;  %s38_s20 = ssub.s32 %s615_s13, %s793_s17 }
   0xe   : > { %p82_p6 = scmp.eq.s32.totalorder %s381_s15, 1  ;;  %p41_p7 = scmp.eq.s32.totalorder %s38_s20, 0 }
   0xf   : > { %p687_p8 = por %p57_p5, %p56_p3  ;;  %p88_p10 = scmp.eq.s32.totalorder %s382_s16, 1 }
  0x10   : > { %p691_p9 = por %p82_p6, %p50_p1  ;;  %p384_p12 = scmp.ge.s32.totalorder %s619_s14, 2 }
  0x11   : > { %s696_s23 = scalar_select %p41_p7, %s607_s11, %s43_s18  }
  0x12   : > { %p698_p11 = por %p88_p10, %p56_p3  ;;  %p419_p13 = scmp.lt.s32.totalorder %s619_s14, 2 }
  0x13   : > { %s136_s25 = sand.u32 1, %s607_s11   ;;  %s398_s27 = sshll.u32 %s615_s13, 3 }
  0x14   : > { %s399_s26 = smul.u32 6, %s136_s25  ;;  %p409_p0 = pnand %p419_p13, %p681_p4 }
  0x15   : > { %s146_s30 = scalar_lea.hbm %s780_s0, %s398_s27  ;;  %p387_p1 = scmp.ge.s32.totalorder %s619_s14, 1 }
  0x16   : > { %s147_s3 = sshll.u32 %s146_s30, 4  ;;  %s140_s4 = scalar_lea.vmem [#allocation2], %s399_s26  ;;  %s148_s3 = int_to_ptr.hbm [resolvable:$true] %s147_s3 }
  0x17   : > { %s149_s5 = sshll.u32 %s140_s4, 4  ;;  %s137_s6 = scalar_lea.sflag [#allocation3], %s136_s25  ;;  %s150_s5 = int_to_ptr.vmem [resolvable:$true] %s149_s5 }
  0x18   : > { %s621_s7 = smov 32   ;;  %s622_s8 = smov 2  }
  0x19   : > { %411 = dma.hbm_to_vmem [thread:$0]  (!%p409_p0), %s148_s3, 96, %s150_s5, %s137_s6, %s621_s7, %s621_s7, %s622_s8  }
  0x1a   : > { %p157_p2 = scmp.lt.s32.totalorder %s619_s14, 3 }
  0x1c   : > { %p158_p3 = pnand %p387_p1, %p157_p2 }
  0x1d   : > { %s714_s15 = sand.u32 (!%p158_p3), 1, %s603_s10  }
  0x1e   : > { %161 = sbr.rel (%p158_p3) target bundleno = 75 (0x4b), region = 24  ;;  %s164_s18 = scalar_lea.sflag (!%p158_p3), [#allocation3], %s714_s15 }
  0x1f   : > { %s400_s16 = smul.u32 (!%p158_p3), 6, %s714_s15 }
  0x21   : > { %s167_s19 = scalar_lea.vmem (!%p158_p3), [#allocation2], %s400_s16 }
  0x23   : > { %586 = dma.done.wait (%p687_p8), %s164_s18, 96  }
  0x24   : > { %588 = vsyncadd (%p687_p8), %s164_s18, 4294967200  ;;  %s388_s20 = sshll.u32 %s714_s15, 1  ;;  %s395_s27 = sshll.u32 %s611_s12, 1  ;;  %v194_v0 = vld [vmem:[%s167_s19] sm:$0x3] }
  0x25   : > { %s193_s25 = scalar_lea.vmem [#allocation6], %s388_s20  ;;  %v389_v1 = vld [vmem:[%s167_s19 + $0x2] sm:$0x3]  ;;  %v390_v2 = vld [vmem:[%s167_s19 + $0x4] sm:$0x3]  ;;  %s260_s30 = scalar_lea.hbm %s782_s2, %s395_s27 }
  0x26   : > { %s262_s26 = sshll.u32 %s193_s25, 4  ;;  %v199_v3 = vmax.f32 %v194_v0, %v389_v1  ;;  %s264_s3 = sshll.u32 %s260_s30, 4  ;;  %s263_s26 = int_to_ptr.vmem [resolvable:$true] %s262_s26  ;;  %s265_s3 = int_to_ptr.hbm [resolvable:$true] %s264_s3 }
  0x27   : > { %s231_s21 = scalar_lea.sflag [#allocation7], %s714_s15  ;;  %s519_s4 = sshra.s32 %s265_s3, 4  ;;  %s520_s4 = int_to_ptr.hbm [resolvable:$true] %s519_s4 }
  0x28   : > { %v200_v4 = vmax.f32 %v199_v3, %v390_v2  ;;  %s521_s5 = scalar_lea.hbm %s520_s4, 2  ;;  %s525_s8 = scalar_lea.hbm %s782_s2, 4 }
  0x29   : > { %p522_p4 = scmp.ne.s32.totalorder %s520_s4, %s521_s5  ;;  %p526_p7 = scmp.lt.s32.totalorder %s520_s4, %s782_s2 }
  0x2a   : > { %v201_v5 = vadd.f32 1e-07, %v200_v4  ;;  %224 = vst [vmem:[%s193_s25] sm:$0x3] %v200_v4  ;;  %p527_p8 = scmp.lt.s32.totalorder %s525_s8, %s521_s5 }
  0x2b   : > { %p523_p5 = pnand %p522_p4, %p691_p9 }
  0x2c   : > { %p528_p10 = por %p527_p8, %p526_p7 }
  0x2d   : > { %p524_p6 = pneg %p523_p5 }
  0x2f   : > { %p529_p13 = pnand %p528_p10, %p524_p6 }
  0x31   : > { %532 = shalt.err (!%p529_p13)
}
  0x32   : > { %405 = dma.vmem_to_hbm [thread:$0]  (%p691_p9), %s263_s26, 32, %s265_s3, %s231_s21   ;;  %473 = vrcp.f32 %v201_v5  ;;  %v213_v8 = vand.u32 2147483648, %v201_v5  ;;  %vm207_vm0 = vweird.f32 %v201_v5  ;;  %v211_v10 = vand.u32 2147483647, %v201_v5 }
  0x33   : > { %s401_s20 = smul.u32 6, %s611_s12  ;;  %s186_s28 = scalar_lea.vmem [#allocation5], %s400_s16 }
  0x34   : > { %v214_v12 = vor.u32 1.1754944e-38, %v213_v8  ;;  %vm212_vm3 = vcmp.eq.f32.partialorder %v211_v10, 8.507059e+37  ;;  %s244_s29 = sshll.u32 %s186_s28, 4  ;;  %s226_s12 = scalar_lea.sflag [#allocation4], %s714_s15  ;;  %s245_s29 = int_to_ptr.vmem [resolvable:$true] %s244_s29 }
  0x35   : > { %s243_s26 = scalar_lea.hbm %s781_s1, %s401_s20  ;;  %s553_s5 = scalar_lea.hbm %s781_s1, 12 }
  0x36   : > { %s246_s30 = sshll.u32 %s243_s26, 4  ;;  %s247_s30 = int_to_ptr.hbm [resolvable:$true] %s246_s30 }
  0x37   : > { %s547_s3 = sshra.s32 %s247_s30, 4  ;;  %s548_s3 = int_to_ptr.hbm [resolvable:$true] %s547_s3 }
  0x38   : > { %v474_v6 = vpop.eup %473  ;;  %s549_s21 = scalar_lea.hbm %s548_s3, 6  ;;  %p554_p3 = scmp.lt.s32.totalorder %s548_s3, %s781_s1 }
  0x39   : > { %v203_v7 = vmul.f32 %v474_v6, %v201_v5  ;;  %vm208_vm1 = vweird.f32 %v474_v6  ;;  %p550_p0 = scmp.ne.s32.totalorder %s548_s3, %s549_s21  ;;  %p555_p4 = scmp.lt.s32.totalorder %s553_s5, %s549_s21 }
  0x3a   : > { %vm209_vm2 = vmor %vm207_vm0, %vm208_vm1 }
  0x3b   : > { %v204_v9 = vsub.f32 1.0, %v203_v7  ;;  %p551_p1 = pnand %p550_p0, %p691_p9  ;;  %p556_p5 = por %p555_p4, %p554_p3 }
  0x3d   : > { %v205_v11 = vmul.f32 %v474_v6, %v204_v9  ;;  %p552_p2 = pneg %p551_p1 }
  0x3f   : > { %v206_v13 = vadd.f32 %v474_v6, %v205_v11  ;;  %p557_p6 = pnand %p556_p5, %p552_p2 }
  0x41   : > { %v210_v14 = vsel %vm209_vm2, %v474_v6, %v206_v13 }
  0x42   : > { %v215_v15 = vsel %vm212_vm3, %v214_v12, %v210_v14 }
  0x43   : > { %v216_v16 = vmul.f32 %v215_v15, %v194_v0  ;;  %v218_v17 = vmul.f32 %v389_v1, %v215_v15  ;;  %v221_v18 = vmul.f32 %v390_v2, %v215_v15 }
  0x45   : > { %217 = vst [vmem:[%s186_s28] sm:$0x3] %v216_v16 }
  0x46   : > { %391 = vst [vmem:[%s186_s28 + $0x2] sm:$0x3] %v218_v17 }
  0x47   : > { %392 = vst [vmem:[%s186_s28 + $0x4] sm:$0x3] %v221_v18 }
  0x48   : > { %560 = shalt.err (!%p557_p6)
}
  0x49   : > { %s623_s15 = smov 32   ;;  %s624_s8 = smov 2  }
  0x4a   : > { %404 = dma.vmem_to_hbm [thread:$0]  (%p691_p9), %s245_s29, 96, %s247_s30, %s226_s12, %s623_s15, %s623_s15, %s624_s8  }
  0x4b PF: > { %s276_s18 = sand.u32 1, %s599_s9   ;;  %p413_p7 = pnand %p384_p12, %p698_p11 }
  0x4c   : > { %s277_s19 = scalar_lea.sflag [#allocation4], %s276_s18 }
  0x4d   : > { %p414_p8 = pneg %p413_p7 }
  0x4f   : > { %590 = dma.done.wait (%p414_p8), %s277_s19, 96  }
  0x50   : > { %592 = vsyncadd (%p414_p8), %s277_s19, 4294967200  ;;  %s287_s20 = scalar_lea.sflag [#allocation7], %s276_s18 }
  0x51   : > { %594 = dma.done.wait (%p414_p8), %s287_s20, 32  }
  0x52   : > { %596 = vsyncadd (%p414_p8), %s287_s20, 4294967264  ;;  %s22_s14 = sadd.s32 1, %s619_s14   ;;  %s787_s9 = smov %s603_s10 }
  0x53   : > { %p19_p10 = scmp.ge.s32.totalorder %s22_s14, 4   ;;  %s788_s10 = smov %s607_s11 }
  0x54   : > { %s789_s11 = smov %s696_s23  ;;  %s790_s12 = smov %s615_s13 }
  0x55   : > { %s791_s13 = smov %s793_s17  ;;  %21 = sbr.rel (!%p19_p10) target bundleno = 8 (0x8), region = 90 }
  0x5a   :  { %293 = vsyncpa [#allocation3], 1 }
  0x5b   :  { %295 = vsyncpa [#allocation3 + $0x1], 1 }
  0x5c   :  { %296 = vsyncpa [#allocation4], 1 }
  0x5d   :  { %298 = vsyncpa [#allocation4 + $0x1], 1 }
  0x5e   :  { %299 = vsyncpa [#allocation7], 1 }
  0x5f   :  { %301 = vsyncpa [#allocation7 + $0x1], 1 }

</bundles_post_ra>
